<compile_context>
chip_gen: v6e
topology: v6e:2x2x1
jax: 0.10.0
libtpu: 0.0.40
codegen_flags: <defaults>
</compile_context>

<pallas_src>
import functools

import jax
import jax.numpy as jnp
from jax import lax
from jax.experimental import pallas as pl
from jax.experimental.pallas import tpu as pltpu


# ------------------------------ small helpers ------------------------------

def _rup(x, m):
    return ((x + m - 1) // m) * m


def _pad2(a, rows, cols):
    r, c = a.shape
    return jnp.pad(a, ((0, rows - r), (0, cols - c)))


def _pad_gate_cols(w, H, Hp):
    """(R, 4*H) -> (R, 4*Hp): pad each PyTorch gate block (i,f,g,o) from H to Hp."""
    R = w.shape[0]
    w = w.reshape(R, 4, H)
    w = jnp.pad(w, ((0, 0), (0, 0), (0, Hp - H)))
    return w.reshape(R, 4 * Hp)


def _largest_tile(dim, cap, quantum):
    """Largest divisor of `dim` that is <= cap and a multiple of `quantum`.
    Assumes dim is a multiple of quantum."""
    t = min(dim, cap)
    t -= t % quantum
    t = max(t, quantum)
    while dim % t:
        t -= quantum
    return t


# ----------------------------- Pallas kernels -----------------------------

def _linear_kernel(x_ref, w_ref, b_ref, o_ref, *, relu):
    y = jnp.dot(x_ref[...], w_ref[...], preferred_element_type=jnp.float32)
    y = y + b_ref[...]
    if relu:
        y = jnp.maximum(y, 0.0)
    o_ref[...] = y.astype(o_ref.dtype)


def pallas_linear(x, w, b, *, relu=False):
    """f32( x @ w + b ), optionally ReLU.  x:(M,K) bf16, w:(K,N) bf16, b:(1,N) f32.

    Tiled over (M, N) with both axes parallel (megacore / v7x 2-TC friendly);
    K stays resident (small, already 128-padded).
    """
    M, K = x.shape
    N = w.shape[1]
    tm = _largest_tile(M, 256, 8)
    tn = _largest_tile(N, 512, 128)
    grid = (M // tm, N // tn)
    return pl.pallas_call(
        functools.partial(_linear_kernel, relu=relu),
        out_shape=jax.ShapeDtypeStruct((M, N), jnp.float32),
        grid=grid,
        in_specs=[pl.BlockSpec((tm, K), lambda i, j: (i, 0)),
                  pl.BlockSpec((K, tn), lambda i, j: (0, j)),
                  pl.BlockSpec((1, tn), lambda i, j: (0, j))],
        out_specs=pl.BlockSpec((tm, tn), lambda i, j: (i, j)),
        compiler_params=pltpu.CompilerParams(
            dimension_semantics=("parallel", "parallel")),
    )(x, w, b)


def _lstm_kernel(x_ref, wih_ref, whh_ref, gs_ref, o_ref, h_sc, c_sc):
    """Whole-sequence LSTM layer in one invocation.

    x_ref  : (T, B, I)  bf16 time-major per-step inputs (word-embedding part only
             for layer 0; previous-layer hiddens for deeper layers).
    wih_ref: (I, 4*Hp)  bf16
    whh_ref: (Hp, 4*Hp) bf16
    gs_ref : (B, 4*Hp)  f32  time-invariant gate pre-activations (static input
             contribution + combined bias) — hoisted out of the recurrence.
    o_ref  : (T, B, Hp) bf16 hidden states for every timestep.
    h_sc/c_sc: (B, Hp) f32 VMEM scratch for the recurrent state (zero init,
             matching PyTorch hx=None).
    """
    T = x_ref.shape[0]
    H = h_sc.shape[-1]          # padded hidden (multiple of 128) -> lane-aligned slices

    h_sc[...] = jnp.zeros_like(h_sc)
    c_sc[...] = jnp.zeros_like(c_sc)
    gs = gs_ref[...]            # (B, 4H) f32, loop-invariant

    def step(t, carry):
        x_t = x_ref[t]                                          # (B, I) bf16
        h_b = h_sc[...].astype(jnp.bfloat16)
        gates = (jnp.dot(x_t, wih_ref[...], preferred_element_type=jnp.float32)
                 + jnp.dot(h_b, whh_ref[...], preferred_element_type=jnp.float32)
                 + gs)                                          # (B, 4H) f32
        # PyTorch gate order: input, forget, cell(g), output — 128-lane aligned slices
        i_g = jax.nn.sigmoid(gates[:, 0 * H:1 * H])
        f_g = jax.nn.sigmoid(gates[:, 1 * H:2 * H])
        g_g = jnp.tanh(gates[:, 2 * H:3 * H])
        o_g = jax.nn.sigmoid(gates[:, 3 * H:4 * H])
        c = f_g * c_sc[...] + i_g * g_g                         # f32 state math (v5e-safe)
        h = o_g * jnp.tanh(c)
        c_sc[...] = c
        h_sc[...] = h
        o_ref[t] = h.astype(o_ref.dtype)
        return carry

    lax.fori_loop(0, T, step, 0, unroll=True)


def lstm_layer(x_tbi, w_ih, w_hh, gates_static):
    """x_tbi: (T, Bp, I) bf16; returns hiddens (T, Bp, Hp) bf16."""
    T, Bp, I = x_tbi.shape
    Hp = w_hh.shape[0]
    return pl.pallas_call(
        _lstm_kernel,
        out_shape=jax.ShapeDtypeStruct((T, Bp, Hp), jnp.bfloat16),
        grid=(1,),
        in_specs=[pl.BlockSpec((T, Bp, I), lambda i: (0, 0, 0)),
                  pl.BlockSpec((I, 4 * Hp), lambda i: (0, 0)),
                  pl.BlockSpec((Hp, 4 * Hp), lambda i: (0, 0)),
                  pl.BlockSpec((Bp, 4 * Hp), lambda i: (0, 0))],
        out_specs=pl.BlockSpec((T, Bp, Hp), lambda i: (0, 0, 0)),
        scratch_shapes=[pltpu.VMEM((Bp, Hp), jnp.float32),
                        pltpu.VMEM((Bp, Hp), jnp.float32)],
        compiler_params=pltpu.CompilerParams(
            dimension_semantics=("arbitrary",)),
    )(x_tbi, w_ih, w_hh, gates_static)


# ------------------------------ Model wrapper ------------------------------

class QGenImgCapPallas:
    def __init__(self, key, **kwargs):
        a = kwargs
        self.args = a
        V = a['vocab_size']
        W = a['word_embedding_dim']
        E = a['encoder_hidden_dim']
        H = a['hidden_dim']
        L = a['num_layers']

        self.Wp = _rup(W, 128)
        self.Hp = _rup(H, 128)
        self.Vp = _rup(V, 128)

        keys = jax.random.split(key, 32)
        kit = iter(keys)

        def init(shape, scale=0.1):
            return (scale * jax.random.normal(next(kit), shape)).astype(jnp.float32)

        # nn.Embedding(vocab_size, word_embedding_dim, padding_idx=pad)
        emb = init((V, W))
        emb = emb.at[a['word_pad_token']].set(0.0)
        self.emb_table = _pad2(emb, V, self.Wp).astype(jnp.bfloat16)

        # nn.Linear(visual_features_dim, scale_visual_to)
        if a['visual']:
            Vd, S = a['visual_features_dim'], a['scale_visual_to']
            self.Vdp = _rup(Vd, 128)
            self.Sp = _rup(S, 128)
            w_vis = init((Vd, S))
            b_vis = init((1, S))
            self.w_vis = _pad2(w_vis, self.Vdp, self.Sp).astype(jnp.bfloat16)
            self.b_vis = _pad2(b_vis, 1, self.Sp)
            static_dim = S + E
        else:
            static_dim = E
        self.static_dim = static_dim
        self.SEp = _rup(static_dim, 128)

        # nn.LSTM(W + static_dim, hidden_dim, num_layers, batch_first=True)
        self.lstm = []
        Hp = self.Hp
        in_dim = W + static_dim
        for l in range(L):
            w_ih = init((in_dim, 4 * H))
            w_hh = init((H, 4 * H))
            b = init((1, 4 * H))              # combined b_ih + b_hh
            if l == 0:
                # Split the input weights: per-step (word-embedding) rows vs.
                # time-invariant ([proj_vis | enc]) rows.
                w_ih_x = _pad2(_pad_gate_cols(w_ih[:W], H, Hp),
                               self.Wp, 4 * Hp).astype(jnp.bfloat16)
                w_ih_s = _pad2(_pad_gate_cols(w_ih[W:], H, Hp),
                               self.SEp, 4 * Hp).astype(jnp.bfloat16)
            else:
                w_ih_x = _pad2(_pad_gate_cols(w_ih, H, Hp),
                               Hp, 4 * Hp).astype(jnp.bfloat16)
                w_ih_s = None
            w_hh_p = _pad2(_pad_gate_cols(w_hh, H, Hp), Hp, 4 * Hp).astype(jnp.bfloat16)
            b_p = _pad_gate_cols(b, H, Hp)    # (1, 4*Hp) f32
            self.lstm.append(dict(w_ih_x=w_ih_x, w_ih_s=w_ih_s, w_hh=w_hh_p, b=b_p))
            in_dim = H

        # nn.Linear(hidden_dim, vocab_size)
        w_log = init((H, V))
        b_log = init((1, V))
        self.w_logits = _pad2(w_log, Hp, self.Vp).astype(jnp.bfloat16)
        self.b_logits = _pad2(b_log, 1, self.Vp)

    def forward(self, src_q, encoder_hidden, visual_features, lengths=None):
        # NOTE: `lengths` is accepted but unused — this matches the PyTorch
        # reference forward(), which reads it from kwargs and never uses it.
        a = self.args
        B, T = src_q.shape
        V, H = a['vocab_size'], a['hidden_dim']
        Hp, Vp = self.Hp, self.Vp
        Bp = _rup(B, 8)                                    # sublane-pad batch

        # Word embedding gather, directly time-major & batch-padded (JAX glue).
        ids = jnp.transpose(src_q, (1, 0))                 # (T, B) — tiny int transpose
        ids = jnp.pad(ids, ((0, 0), (0, Bp - B)))          # padded rows -> pad token 0
        emb = jnp.take(self.emb_table, ids, axis=0)        # (T, Bp, Wp) bf16

        # encoder_hidden: (B, 1, E) -> (Bp, E)
        enc = jnp.squeeze(encoder_hidden, axis=1)
        enc = jnp.pad(enc, ((0, Bp - B), (0, 0)))

        if a['visual']:
            S = a['scale_visual_to']
            vis = jnp.pad(visual_features,
                          ((0, Bp - B), (0, self.Vdp - visual_features.shape[1])))
            proj = pallas_linear(vis.astype(jnp.bfloat16), self.w_vis, self.b_vis,
                                 relu=True)                # (Bp, Sp) f32
            static = jnp.concatenate([proj[:, :S], enc], axis=1)   # (Bp, S+E)
        else:
            static = enc                                            # (Bp, E)
        static = jnp.pad(static, ((0, 0), (0, self.SEp - static.shape[1])))
        static = static.astype(jnp.bfloat16)

        x = emb                                            # (T, Bp, Wp) bf16
        for l, p in enumerate(self.lstm):
            if l == 0:
                # Time-invariant gate pre-activations (+ bias), one GEMM per forward.
                gs = pallas_linear(static, p['w_ih_s'], p['b'])     # (Bp, 4Hp) f32
            else:
                gs = jnp.broadcast_to(p['b'], (Bp, 4 * Hp)).astype(jnp.float32)
            x = lstm_layer(x, p['w_ih_x'], p['w_hh'], gs)           # (T, Bp, Hp) bf16

        # to_logits on flattened (T*Bp, Hp) — tiled, both grid axes parallel.
        flat = x.reshape(T * Bp, Hp)
        logits = pallas_linear(flat, self.w_logits, self.b_logits)  # (T*Bp, Vp) f32
        logits = logits.reshape(T, Bp, Vp).transpose(1, 0, 2)[:B, :, :V]
        return logits


# ---------------------------------- main -----------------------------------

if __name__ == "__main__":
    cfg = dict(
        vocab_size=32,
        word_embedding_dim=16,
        word_pad_token=0,
        start_token=1,
        visual=True,
        visual_features_dim=24,
        scale_visual_to=16,
        encoder_hidden_dim=32,
        hidden_dim=32,
        num_layers=1,
        max_tgt_length=8,
    )
    B, T = 4, cfg['max_tgt_length']

    key = jax.random.PRNGKey(0)
    k_model, k_q, k_enc, k_vis = jax.random.split(key, 4)

    model = QGenImgCapPallas(k_model, **cfg)

    src_q = jax.random.randint(k_q, (B, T), 0, cfg['vocab_size'])
    encoder_hidden = jax.random.normal(
        k_enc, (B, 1, cfg['encoder_hidden_dim'])).astype(jnp.float32)
    visual_features = jax.random.normal(
        k_vis, (B, cfg['visual_features_dim'])).astype(jnp.float32)
    lengths = jnp.full((B,), T, dtype=jnp.int32)   # parity with PyTorch; unused in fwd

    word_logits = model.forward(src_q, encoder_hidden, visual_features, lengths)
    word_logits = jax.block_until_ready(word_logits)

    assert word_logits.shape == (B, T, cfg['vocab_size'])
    assert word_logits.dtype == jnp.float32
    print("KERNEL_OK")
</pallas_src>

<mosaic_0001>
module attributes {stable_mosaic.version = 11 : i64} {
  func.func @_linear_kernel(%arg0: i32, %arg1: i32, %arg2: memref<8x128xbf16, #tpu.memory_space<vmem>>, %arg3: memref<128x128xbf16, #tpu.memory_space<vmem>>, %arg4: memref<1x128xf32, #tpu.memory_space<vmem>>, %arg5: memref<8x128xf32, #tpu.memory_space<vmem>>) attributes {dimension_semantics = [#tpu.dimension_semantics<parallel>, #tpu.dimension_semantics<parallel>], iteration_bounds = array<i64: 1, 1>, scalar_prefetch = 0 : i64, scratch_operands = 0 : i64, tpu.core_type = #tpu.core_type<tc>, window_params = [{transform_indices = @transform_0, window_bounds = array<i64: 8, 128>}, {transform_indices = @transform_1, window_bounds = array<i64: 128, 128>}, {transform_indices = @transform_2, window_bounds = array<i64: 1, 128>}, {transform_indices = @transform_3, window_bounds = array<i64: 8, 128>}]} {
    %c0 = arith.constant 0 : index
    %c0_0 = arith.constant 0 : index
    %0 = vector.load %arg2[%c0, %c0_0] : memref<8x128xbf16, #tpu.memory_space<vmem>>, vector<8x128xbf16>
    %c0_1 = arith.constant 0 : index
    %c0_2 = arith.constant 0 : index
    %1 = vector.load %arg3[%c0_1, %c0_2] : memref<128x128xbf16, #tpu.memory_space<vmem>>, vector<128x128xbf16>
    %cst = arith.constant dense<0.000000e+00> : vector<8x128xf32>
    %2 = tpu.matmul %0, %1, %cst {dimension_numbers = #tpu.dot_dimension_numbers<[1], [0], [0], [1], [0, 0, 1, 1], [], []>} : vector<8x128xbf16>, vector<128x128xbf16>, vector<8x128xf32> -> vector<8x128xf32>
    %c0_3 = arith.constant 0 : index
    %c0_4 = arith.constant 0 : index
    %3 = vector.load %arg4[%c0_3, %c0_4] : memref<1x128xf32, #tpu.memory_space<vmem>>, vector<1x128xf32>
    %4 = vector.broadcast %3 : vector<1x128xf32> to vector<8x128xf32>
    %5 = arith.addf %2, %4 : vector<8x128xf32>
    %cst_5 = arith.constant 0.000000e+00 : f32
    %6 = vector.broadcast %cst_5 : f32 to vector<8x128xf32>
    %7 = arith.maximumf %5, %6 : vector<8x128xf32>
    %c0_6 = arith.constant 0 : index
    %c0_7 = arith.constant 0 : index
    %8 = vector.load %arg5[%c0_6, %c0_7] : memref<8x128xf32, #tpu.memory_space<vmem>>, vector<8x128xf32>
    tpu.vector_store %arg5[%c0_6, %c0_7], %7 {strides = array<i32>} : memref<8x128xf32, #tpu.memory_space<vmem>>, vector<8x128xf32>,
    return
  }
  func.func @transform_0(%arg0: i32, %arg1: i32) -> (i32, i32) {
    %c0_i32 = arith.constant 0 : i32
    %c0_i32_0 = arith.constant 0 : i32
    return %arg0, %c0_i32 : i32, i32
  }
  func.func @transform_1(%arg0: i32, %arg1: i32) -> (i32, i32) {
    %c0_i32 = arith.constant 0 : i32
    %c0_i32_0 = arith.constant 0 : i32
    return %c0_i32, %arg1 : i32, i32
  }
  func.func @transform_2(%arg0: i32, %arg1: i32) -> (i32, i32) {
    %c0_i32 = arith.constant 0 : i32
    %c0_i32_0 = arith.constant 0 : i32
    return %c0_i32, %arg1 : i32, i32
  }
  func.func @transform_3(%arg0: i32, %arg1: i32) -> (i32, i32) {
    %c0_i32 = arith.constant 0 : i32
    return %arg0, %arg1 : i32, i32
  }
}

</mosaic_0001>

<bundles_post_ra>
// kernel: tpu_custom_call.1
= control target key start
LH: loop header
LB: loop body
LE: loop exit
PB: predicated region body
PF: predicated region fallthrough
CT: control target
= control target key end

     0   :  { %8 = vsyncpa [#allocation3], 0  ;;  %s330_s0 = inlined_call_operand.hbm [shape: bf16[8,128], index: 0, kind: input, shape index: {}]   ;;  %s331_s1 = inlined_call_operand.hbm [shape: bf16[128,128], index: 1, kind: input, shape index: {}]   ;;  %s332_s2 = inlined_call_operand.vmem [shape: f32[1,128], index: 2, kind: input, shape index: {}]   ;;  %s333_s3 = inlined_call_operand.hbm [shape: f32[8,128], index: 3, kind: output, shape index: {}]  }
   0x1   :  { %9 = vsyncpa [#allocation6], 0 }
   0x2   :  { %10 = vsyncpa [#allocation4], 0  ;;  %s291_s12 = smov [#allocation2]   ;;  %s292_s14 = smov [#allocation5]  }
   0x3   :  { %s17_s13 = sshll.u32 %s291_s12, 4  ;;  %s26_s15 = sshll.u32 %s292_s14, 4  ;;  %s18_s13 = int_to_ptr.vmem [resolvable:$true] %s17_s13  ;;  %s27_s15 = int_to_ptr.vmem [resolvable:$true] %s26_s15 }
   0x4   :  { %s233_s16 = scalar_lea.vmem %s18_s13, 64  ;;  %p238_p1 = scmp.lt.s32.totalorder %s18_s13, %s18_s13 }
   0x5   :  { %p234_p0 = scmp.ne.s32.totalorder %s18_s13, %s233_s16  ;;  %p239_p2 = scmp.lt.s32.totalorder %s233_s16, %s233_s16 }
   0x7   :  { %p240_p3 = por %p239_p2, %p238_p1 }
   0x9   :  { %p241_p4 = pnand %p240_p3, %p234_p0 }
   0xb   :  { %244 = shalt.err (!%p241_p4)
}
   0xc   :  { %20 = dma.hbm_to_vmem [thread:$0]  %s330_s0, 64, %s18_s13, [#allocation3]  }
   0xd   :  { %s253_s19 = scalar_lea.vmem %s27_s15, 1024  ;;  %p258_p6 = scmp.lt.s32.totalorder %s27_s15, %s27_s15 }
   0xe   :  { %p254_p5 = scmp.ne.s32.totalorder %s27_s15, %s253_s19  ;;  %p259_p7 = scmp.lt.s32.totalorder %s253_s19, %s253_s19 }
  0x10   :  { %p260_p8 = por %p259_p7, %p258_p6 }
  0x12   :  { %p261_p9 = pnand %p260_p8, %p254_p5 }
  0x14   :  { %264 = shalt.err (!%p261_p9)
}
  0x15   :  { %s293_s20 = smov 64   ;;  %s294_s21 = smov 4  }
  0x16   :  { %32 = dma.hbm_to_vmem [thread:$0]  %s331_s1, 1024, %s27_s15, [#allocation6], %s293_s20, %s293_s20, %s294_s21  }
  0x17   :  { %285 = dma.done.wait [#allocation3], 64  }
  0x18   :  { %286 = vsyncadd [#allocation3], 4294967232 }
  0x19   :  { %287 = dma.done.wait [#allocation6], 1024  }
  0x1a   :  { %288 = vsyncadd [#allocation6], 4294966272  ;;  %v295_v0 = vmov 0.0   ;;  %vm296_vm0 = vmmov 0   ;;  %v217_v1 = vld [vmem:[#allocation5 + $0x38] sm:$0xff]   ;;  %v218_v2 = vld [vmem:[#allocation5 + $0x30] sm:$0xff]  }
  0x1b   :  { %190 = vmatprep.subr.bf16.mxu0 %v295_v0  ;;  %206 = vmatprep.mubr.msk.bf16.mxu0 %vm296_vm0, %v295_v0  ;;  %v219_v3 = vld [vmem:[#allocation5 + $0x28] sm:$0xff]   ;;  %v220_v4 = vld [vmem:[#allocation5 + $0x20] sm:$0xff]   ;;  %v221_v5 = vld [vmem:[#allocation5 + $0x18] sm:$0xff]   ;;  %s297_s24 = smov [#allocation7]  }
  0x1c   :  { %191 = vmatpush3.bf16.msra.mxu0 %v217_v1  ;;  %v222_v6 = vld [vmem:[#allocation5 + $0x10] sm:$0xff]   ;;  %v223_v7 = vld [vmem:[#allocation5 + $0x8] sm:$0xff]   ;;  %v224_v8 = vld [vmem:[#allocation5] sm:$0xff]   ;;  %s162_s25 = sshll.u32 %s297_s24, 4  ;;  %s163_s25 = int_to_ptr.vmem [resolvable:$true] %s162_s25 }
  0x1d   :  { %192 = vmatprep.subr.bf16.mxu0 %v295_v0  ;;  %v42_v9 = vld [vmem:[#allocation2] sm:$0xf]  ;;  %s265_s26 = scalar_lea.vmem %s163_s25, 128  ;;  %p270_p11 = scmp.lt.s32.totalorder %s163_s25, %s163_s25 }
  0x1e   :  { %v172_v10 = vld [vmem:[%s332_s2] ss:$0 sm:$0xff]  ;;  %p266_p10 = scmp.ne.s32.totalorder %s163_s25, %s265_s26  ;;  %p271_p12 = scmp.lt.s32.totalorder %s265_s26, %s265_s26 }
  0x20   :  { %193 = vmatpush3.bf16.msra.mxu0 %v218_v2  ;;  %p272_p13 = por %p271_p12, %p270_p11 }
  0x21   :  { %194 = vmatprep.subr.bf16.mxu0 %v295_v0 }
  0x22   :  { %p273_p0 = pnand %p272_p13, %p266_p10 }
  0x24   :  { %195 = vmatpush3.bf16.msra.mxu0 %v219_v3 }
  0x25   :  { %196 = vmatprep.subr.bf16.mxu0 %v295_v0 }
  0x28   :  { %197 = vmatpush3.bf16.msra.mxu0 %v220_v4 }
  0x29   :  { %198 = vmatprep.subr.bf16.mxu0 %v295_v0 }
  0x2c   :  { %199 = vmatpush3.bf16.msra.mxu0 %v221_v5 }
  0x2d   :  { %200 = vmatprep.subr.bf16.mxu0 %v295_v0 }
  0x30   :  { %201 = vmatpush3.bf16.msra.mxu0 %v222_v6 }
  0x31   :  { %202 = vmatprep.subr.bf16.mxu0 %v295_v0 }
  0x34   :  { %203 = vmatpush3.bf16.msra.mxu0 %v223_v7 }
  0x35   :  { %204 = vmatprep.subr.bf16.mxu0 %v295_v0 }
  0x38   :  { %205 = vmatpush3.bf16.msra.mxu0 %v224_v8 }
  0x3b   :  { %207 = vmatmul.mubr.bf16.vlgmr.msra.gmra.mxu0 %v42_v9 }
  0xfb   :  { %v148_v11 = vpop.f32.mrf.mxu0 }
  0xfc   :  { %v149_v12 = vadd.f32 %v172_v10, %v148_v11 }
  0xfd   :  { %v208_v13 = vpop.f32.mrf.mxu0 }
  0xfe   :  { %v154_v14 = vmax.f32 %v149_v12, 0.0 }
  0xff   :  { %v151_v15 = vpop.f32.mrf.mxu0 }
 0x100   :  { %155 = vst [vmem:[#allocation7] sm:$0xff] %v154_v14 }
 0x101   :  { %v209_v16 = vpop.f32.mrf.mxu0 }
 0x102   :  { %276 = shalt.err (!%p273_p0)
}
 0x103   :  { %165 = dma.vmem_to_hbm [thread:$0]  %s163_s25, 128, %s333_s3, [#allocation4]  }
 0x104   :  { %289 = dma.done.wait [#allocation4], 128  }
 0x105   :  { %290 = vsyncadd [#allocation4], 4294967168 }
 0x106   :  { %169 = vsyncpa [#allocation3], 1 }
 0x107   :  { %170 = vsyncpa [#allocation6], 1 }
 0x108   :  { %171 = vsyncpa [#allocation4], 1 }

</bundles_post_ra>
